<compile_context>
chip_gen: v6e
topology: v6e:2x2x1
jax: 0.10.0
libtpu: 0.0.40
codegen_flags: <defaults>
</compile_context>

<pallas_src>
import jax
import jax.numpy as jnp
from jax.experimental import pallas as pl
from jax.experimental.pallas import tpu as pltpu


def speaker_network_forward(x, w_conv, b_conv, w_lin, b_lin, *,
                            t_block=2048, b_block=8):
    """Fused SpeakerNetwork head: y = mean_t(Conv1d(x)); z = Linear(ReLU(y)).

    x:      (B, C_in, T)       activations (batch, channels, time)
    w_conv: (C_out, C_in, K)   torch Conv1d weight layout
    b_conv: (C_out,)
    w_lin:  (S, C_out)         torch Linear weight layout
    b_lin:  (S,)
    returns (y, z) with y: (B, C_out), z: (B, S)
    """
    B, C_in, T = x.shape
    C_out, C_in2, K = w_conv.shape
    S, C_out2 = w_lin.shape
    assert C_in2 == C_in and C_out2 == C_out
    assert K % 2 == 1, "padding = K // 2 preserves length T only for odd kernel_size"
    pad = K // 2
    pad_eff = max(pad, 1)
    assert T > pad

    # ---- tiling choices -------------------------------------------------
    # Time tiles: lane-dense, multiple of 128, at most t_block columns so VMEM
    # is bounded independent of sequence length (safe on v7x's 64 MiB).  Fall
    # back to the full extent if T is not 128-aligned (full dims always legal).
    if T % 128 == 0 and T > t_block:
        tt = 128
        c = 256
        while c <= t_block:
            if T % c == 0:
                tt = c
            c += 128
    else:
        tt = T
    nt = T // tt

    # Batch blocks: amortize per-grid-step overhead and make output DMAs
    # larger.  Prefer a multiple-of-8 divisor (sublane rule for the outputs);
    # otherwise keep the whole batch in one block (full dims always legal).
    if B <= b_block:
        bb = B
    else:
        bb = B
        cand = 8
        while cand <= b_block:
            if B % cand == 0:
                bb = cand
            cand += 8
    nb = B // bb

    # ---- parameter re-layout (tiny, wrapper-side glue only) -------------
    wc = jnp.transpose(w_conv, (2, 1, 0))        # (K, C_in, C_out): wc[k, c, o]
    bconv_row = b_conv.reshape(1, C_out)
    wlin_t = jnp.transpose(w_lin)                # (C_out, S)
    blin_row = b_lin.reshape(1, S)

    inv_T = 1.0 / float(T)
    out_dtype = x.dtype

    def kernel(x_ref, wc_ref, bc_ref, wl_ref, bl_ref, y_ref, z_ref,
               s_sum_ref, lo_ref):
        t = pl.program_id(1)
        n_t = pl.num_programs(1)
        xt = x_ref[...].astype(jnp.float32)              # (bb, C_in, tt)

        @pl.when(t == 0)
        def _init():
            s_sum_ref[...] = jnp.zeros_like(s_sum_ref)
            if pad > 0:
                # First `pad` columns of the full sequence (needed at finalize).
                lo_ref[...] = xt[:, :, :pad]

        # Running per-channel sum over time: pure lane reduction, no MXU work.
        s_sum_ref[...] += jnp.sum(xt, axis=-1)           # (bb, C_in)

        @pl.when(t == n_t - 1)
        def _finalize():
            s = s_sum_ref[...]                           # (bb, C_in)
            if pad > 0:
                lo = lo_ref[...]                         # first pad cols (tile 0)
                hi = xt[:, :, tt - pad:]                 # last pad cols (this tile)
            # mean_t(conv(x)): for tap k with offset d = k - pad, the summed
            # (zero-padded, shifted) input is  S - first d cols (d > 0)
            #                                  S - last |d| cols (d < 0).
            y_acc = jnp.zeros((bb, C_out), jnp.float32)
            for k in range(K):                           # K small -> static unroll
                d = k - pad
                if d == 0:
                    rk = s
                elif d > 0:
                    rk = s - jnp.sum(lo[:, :, :d], axis=-1)
                else:
                    rk = s - jnp.sum(hi[:, :, pad + d:], axis=-1)
                y_acc = y_acc + jnp.dot(rk, wc_ref[k],
                                        preferred_element_type=jnp.float32)
            y_row = y_acc * inv_T + bc_ref[...]          # (bb, C_out), lane-dense
            y_ref[...] = y_row.astype(y_ref.dtype)
            z_row = jnp.dot(jnp.maximum(y_row, 0.0), wl_ref[...],
                            preferred_element_type=jnp.float32) + bl_ref[...]
            z_ref[...] = z_row.astype(z_ref.dtype)       # (bb, S), lane-dense

    grid_spec = pltpu.PrefetchScalarGridSpec(
        num_scalar_prefetch=0,
        grid=(nb, nt),                                   # reduction (time) axis last
        in_specs=[
            pl.BlockSpec((bb, C_in, tt), lambda b, t: (b, 0, t)),
            pl.BlockSpec((K, C_in, C_out), lambda b, t: (0, 0, 0)),
            pl.BlockSpec((1, C_out), lambda b, t: (0, 0)),
            pl.BlockSpec((C_out, S), lambda b, t: (0, 0)),
            pl.BlockSpec((1, S), lambda b, t: (0, 0)),
        ],
        out_specs=[
            pl.BlockSpec((bb, C_out), lambda b, t: (b, 0)),
            pl.BlockSpec((bb, S), lambda b, t: (b, 0)),
        ],
        scratch_shapes=[
            pltpu.VMEM((bb, C_in), jnp.float32),           # running per-channel sums
            pltpu.VMEM((bb, C_in, pad_eff), jnp.float32),  # first pad columns of x
        ],
    )

    y, z = pl.pallas_call(
        kernel,
        out_shape=(jax.ShapeDtypeStruct((B, C_out), out_dtype),
                   jax.ShapeDtypeStruct((B, S), out_dtype)),
        grid_spec=grid_spec,
        compiler_params=pltpu.CompilerParams(
            dimension_semantics=("parallel", "arbitrary"),
            vmem_limit_bytes=32 * 1024 * 1024,
        ),
    )(x, wc, bconv_row, wlin_t, blin_row)
    return y, z


def _reference_forward(x, w_conv, b_conv, w_lin, b_lin):
    """Plain-JAX reference with exact torch Conv1d('same', zero pad)/Linear semantics."""
    B, C_in, T = x.shape
    C_out, _, K = w_conv.shape
    pad = K // 2
    xp = jnp.pad(x, ((0, 0), (0, 0), (pad, pad)))
    y_full = jnp.zeros((B, C_out, T), jnp.float32)
    for k in range(K):
        y_full = y_full + jnp.einsum(
            "oc,bct->bot", w_conv[:, :, k], xp[:, :, k:k + T],
            precision=jax.lax.Precision.HIGHEST)
    y_mean = jnp.mean(y_full, axis=-1) + b_conv[None, :]
    z = jnp.einsum("bo,so->bs", jnp.maximum(y_mean, 0.0), w_lin,
                   precision=jax.lax.Precision.HIGHEST) + b_lin[None, :]
    return y_mean, z


if __name__ == "__main__":
    B, C_IN, T = 2, 32, 512          # time axis lane-dense (multiple of 128)
    C_OUT, K, N_SPK = 64, 3, 8

    def bf16_exact(a):
        # Round test data to bf16-representable values so the comparison is
        # insensitive to the MXU's f32-via-bf16 matmul decomposition.
        return a.astype(jnp.bfloat16).astype(jnp.float32)

    key = jax.random.PRNGKey(0)
    k1, k2, k3, k4, k5 = jax.random.split(key, 5)
    x = bf16_exact(jax.random.normal(k1, (B, C_IN, T), dtype=jnp.float32))
    w_conv = bf16_exact(0.2 * jax.random.normal(k2, (C_OUT, C_IN, K), dtype=jnp.float32))
    b_conv = bf16_exact(0.2 * jax.random.normal(k3, (C_OUT,), dtype=jnp.float32))
    w_lin = bf16_exact(0.2 * jax.random.normal(k4, (N_SPK, C_OUT), dtype=jnp.float32))
    b_lin = bf16_exact(0.2 * jax.random.normal(k5, (N_SPK,), dtype=jnp.float32))

    # t_block=128 exercises the multi-tile streaming path (grid = (1, 4)).
    y, z = speaker_network_forward(x, w_conv, b_conv, w_lin, b_lin, t_block=128)
    y = jax.block_until_ready(y)
    z = jax.block_until_ready(z)

    y_ref, z_ref = _reference_forward(x, w_conv, b_conv, w_lin, b_lin)

    assert y.shape == (B, C_OUT) and z.shape == (B, N_SPK)
    assert jnp.allclose(y, y_ref, atol=1e-3, rtol=1e-3), "y mismatch vs reference"
    assert jnp.allclose(z, z_ref, atol=1e-3, rtol=1e-3), "z mismatch vs reference"

    print("KERNEL_OK")
</pallas_src>

<mosaic_0001>
module attributes {stable_mosaic.version = 11 : i64} {
  func.func @kernel(%arg0: i32, %arg1: i32, %arg2: memref<2x32x128xf32, #tpu.memory_space<vmem>>, %arg3: memref<3x32x64xf32, #tpu.memory_space<vmem>>, %arg4: memref<1x64xf32, #tpu.memory_space<vmem>>, %arg5: memref<64x8xf32, #tpu.memory_space<vmem>>, %arg6: memref<1x8xf32, #tpu.memory_space<vmem>>, %arg7: memref<2x64xf32, #tpu.memory_space<vmem>>, %arg8: memref<2x8xf32, #tpu.memory_space<vmem>>, %arg9: memref<2x32xf32, #tpu.memory_space<vmem>>, %arg10: memref<2x32x1xf32, #tpu.memory_space<vmem>>) attributes {dimension_semantics = [#tpu.dimension_semantics<parallel>, #tpu.dimension_semantics<arbitrary>], iteration_bounds = array<i64: 1, 4>, scalar_prefetch = 0 : i64, scratch_operands = 2 : i64, tpu.core_type = #tpu.core_type<tc>, window_params = [{transform_indices = @transform_0, window_bounds = array<i64: 2, 32, 128>}, {pipeline_mode = #tpu.pipeline_mode<synchronous>, transform_indices = @transform_1, window_bounds = array<i64: 3, 32, 64>}, {pipeline_mode = #tpu.pipeline_mode<synchronous>, transform_indices = @transform_2, window_bounds = array<i64: 1, 64>}, {pipeline_mode = #tpu.pipeline_mode<synchronous>, transform_indices = @transform_3, window_bounds = array<i64: 64, 8>}, {pipeline_mode = #tpu.pipeline_mode<synchronous>, transform_indices = @transform_4, window_bounds = array<i64: 1, 8>}, {transform_indices = @transform_5, window_bounds = array<i64: 2, 64>}, {transform_indices = @transform_6, window_bounds = array<i64: 2, 8>}]} {
    %c0 = arith.constant 0 : index
    %c0_0 = arith.constant 0 : index
    %c0_1 = arith.constant 0 : index
    %0 = vector.load %arg2[%c0, %c0_0, %c0_1] : memref<2x32x128xf32, #tpu.memory_space<vmem>>, vector<2x32x128xf32>
    %c0_i32 = arith.constant 0 : i32
    %1 = arith.cmpi eq, %arg1, %c0_i32 : i32
    %2 = arith.extui %1 : i1 to i32
    %c0_i32_2 = arith.constant 0 : i32
    %3 = arith.cmpi ne, %2, %c0_i32_2 : i32
    scf.if %3 {
      %cst_8 = arith.constant 0.000000e+00 : f32
      %11 = vector.broadcast %cst_8 : f32 to vector<2x32xf32>
      %c0_9 = arith.constant 0 : index
      %c0_10 = arith.constant 0 : index
      %12 = vector.load %arg9[%c0_9, %c0_10] : memref<2x32xf32, #tpu.memory_space<vmem>>, vector<2x32xf32>
      tpu.vector_store %arg9[%c0_9, %c0_10], %11 {strides = array<i32>} : memref<2x32xf32, #tpu.memory_space<vmem>>, vector<2x32xf32>,
      %13 = vector.extract_strided_slice %0 {offsets = [0, 0, 0], sizes = [2, 32, 1], strides = [1, 1, 1]} : vector<2x32x128xf32> to vector<2x32x1xf32>
      %c0_11 = arith.constant 0 : index
      %c0_12 = arith.constant 0 : index
      %c0_13 = arith.constant 0 : index
      %14 = vector.load %arg10[%c0_11, %c0_12, %c0_13] : memref<2x32x1xf32, #tpu.memory_space<vmem>>, vector<2x32x1xf32>
      tpu.vector_store %arg10[%c0_11, %c0_12, %c0_13], %13 {strides = array<i32>} : memref<2x32x1xf32, #tpu.memory_space<vmem>>, vector<2x32x1xf32>,
    } else {
    }
    %c0_3 = arith.constant 0 : index
    %c0_4 = arith.constant 0 : index
    %4 = vector.load %arg9[%c0_3, %c0_4] : memref<2x32xf32, #tpu.memory_space<vmem>>, vector<2x32xf32>
    %cst = arith.constant dense<0.000000e+00> : vector<2x32xf32>
    %5 = vector.multi_reduction <add>, %0, %cst [2] : vector<2x32x128xf32> to vector<2x32xf32>
    %6 = arith.addf %4, %5 : vector<2x32xf32>
    %c0_5 = arith.constant 0 : index
    %c0_6 = arith.constant 0 : index
    %7 = vector.load %arg9[%c0_5, %c0_6] : memref<2x32xf32, #tpu.memory_space<vmem>>, vector<2x32xf32>
    tpu.vector_store %arg9[%c0_5, %c0_6], %6 {strides = array<i32>} : memref<2x32xf32, #tpu.memory_space<vmem>>, vector<2x32xf32>,
    %c3_i32 = arith.constant 3 : i32
    %8 = arith.cmpi eq, %arg1, %c3_i32 : i32
    %9 = arith.extui %8 : i1 to i32
    %c0_i32_7 = arith.constant 0 : i32
    %10 = arith.cmpi ne, %9, %c0_i32_7 : i32
    scf.if %10 {
      %c0_8 = arith.constant 0 : index
      %c0_9 = arith.constant 0 : index
      %11 = vector.load %arg9[%c0_8, %c0_9] : memref<2x32xf32, #tpu.memory_space<vmem>>, vector<2x32xf32>
      %c0_10 = arith.constant 0 : index
      %c0_11 = arith.constant 0 : index
      %c0_12 = arith.constant 0 : index
      %12 = vector.load %arg10[%c0_10, %c0_11, %c0_12] : memref<2x32x1xf32, #tpu.memory_space<vmem>>, vector<2x32x1xf32>
      %13 = vector.extract_strided_slice %0 {offsets = [0, 0, 127], sizes = [2, 32, 1], strides = [1, 1, 1]} : vector<2x32x128xf32> to vector<2x32x1xf32>
      %cst_13 = arith.constant 0.000000e+00 : f32
      %14 = vector.broadcast %cst_13 : f32 to vector<2x64xf32>
      %cst_14 = arith.constant dense<0.000000e+00> : vector<2x32xf32>
      %15 = vector.multi_reduction <add>, %13, %cst_14 [2] : vector<2x32x1xf32> to vector<2x32xf32>
      %16 = arith.subf %11, %15 : vector<2x32xf32>
      %c0_15 = arith.constant 0 : index
      %c0_16 = arith.constant 0 : index
      %c0_17 = arith.constant 0 : index
      %17 = vector.load %arg3[%c0_15, %c0_16, %c0_17] : memref<3x32x64xf32, #tpu.memory_space<vmem>>, vector<1x32x64xf32>
      %18 = vector.shape_cast %17 : vector<1x32x64xf32> to vector<32x64xf32>
      %cst_18 = arith.constant dense<0.000000e+00> : vector<2x64xf32>
      %19 = tpu.matmul %16, %18, %cst_18 {dimension_numbers = #tpu.dot_dimension_numbers<[1], [0], [0], [1], [0, 0, 1, 1], [], []>} : vector<2x32xf32>, vector<32x64xf32>, vector<2x64xf32> -> vector<2x64xf32>
      %20 = arith.addf %14, %19 : vector<2x64xf32>
      %c1 = arith.constant 1 : index
      %c0_19 = arith.constant 0 : index
      %c0_20 = arith.constant 0 : index
      %21 = vector.load %arg3[%c1, %c0_19, %c0_20] : memref<3x32x64xf32, #tpu.memory_space<vmem>>, vector<1x32x64xf32>
      %22 = vector.shape_cast %21 : vector<1x32x64xf32> to vector<32x64xf32>
      %cst_21 = arith.constant dense<0.000000e+00> : vector<2x64xf32>
      %23 = tpu.matmul %11, %22, %cst_21 {dimension_numbers = #tpu.dot_dimension_numbers<[1], [0], [0], [1], [0, 0, 1, 1], [], []>} : vector<2x32xf32>, vector<32x64xf32>, vector<2x64xf32> -> vector<2x64xf32>
      %24 = arith.addf %20, %23 : vector<2x64xf32>
      %cst_22 = arith.constant dense<0.000000e+00> : vector<2x32xf32>
      %25 = vector.multi_reduction <add>, %12, %cst_22 [2] : vector<2x32x1xf32> to vector<2x32xf32>
      %26 = arith.subf %11, %25 : vector<2x32xf32>
      %c2 = arith.constant 2 : index
      %c0_23 = arith.constant 0 : index
      %c0_24 = arith.constant 0 : index
      %27 = vector.load %arg3[%c2, %c0_23, %c0_24] : memref<3x32x64xf32, #tpu.memory_space<vmem>>, vector<1x32x64xf32>
      %28 = vector.shape_cast %27 : vector<1x32x64xf32> to vector<32x64xf32>
      %cst_25 = arith.constant dense<0.000000e+00> : vector<2x64xf32>
      %29 = tpu.matmul %26, %28, %cst_25 {dimension_numbers = #tpu.dot_dimension_numbers<[1], [0], [0], [1], [0, 0, 1, 1], [], []>} : vector<2x32xf32>, vector<32x64xf32>, vector<2x64xf32> -> vector<2x64xf32>
      %30 = arith.addf %24, %29 : vector<2x64xf32>
      %cst_26 = arith.constant 0.001953125 : f32
      %31 = vector.broadcast %cst_26 : f32 to vector<2x64xf32>
      %32 = arith.mulf %30, %31 : vector<2x64xf32>
      %c0_27 = arith.constant 0 : index
      %c0_28 = arith.constant 0 : index
      %33 = vector.load %arg4[%c0_27, %c0_28] : memref<1x64xf32, #tpu.memory_space<vmem>>, vector<1x64xf32>
      %34 = vector.broadcast %33 : vector<1x64xf32> to vector<2x64xf32>
      %35 = arith.addf %32, %34 : vector<2x64xf32>
      %c0_29 = arith.constant 0 : index
      %c0_30 = arith.constant 0 : index
      %36 = vector.load %arg7[%c0_29, %c0_30] : memref<2x64xf32, #tpu.memory_space<vmem>>, vector<2x64xf32>
      tpu.vector_store %arg7[%c0_29, %c0_30], %35 {strides = array<i32>} : memref<2x64xf32, #tpu.memory_space<vmem>>, vector<2x64xf32>,
      %cst_31 = arith.constant 0.000000e+00 : f32
      %37 = vector.broadcast %cst_31 : f32 to vector<2x64xf32>
      %38 = arith.maximumf %35, %37 : vector<2x64xf32>
      %c0_32 = arith.constant 0 : index
      %c0_33 = arith.constant 0 : index
      %39 = vector.load %arg5[%c0_32, %c0_33] : memref<64x8xf32, #tpu.memory_space<vmem>>, vector<64x8xf32>
      %cst_34 = arith.constant dense<0.000000e+00> : vector<2x8xf32>
      %40 = tpu.matmul %38, %39, %cst_34 {dimension_numbers = #tpu.dot_dimension_numbers<[1], [0], [0], [1], [0, 0, 1, 1], [], []>} : vector<2x64xf32>, vector<64x8xf32>, vector<2x8xf32> -> vector<2x8xf32>
      %c0_35 = arith.constant 0 : index
      %c0_36 = arith.constant 0 : index
      %41 = vector.load %arg6[%c0_35, %c0_36] : memref<1x8xf32, #tpu.memory_space<vmem>>, vector<1x8xf32>
      %42 = vector.broadcast %41 : vector<1x8xf32> to vector<2x8xf32>
      %43 = arith.addf %40, %42 : vector<2x8xf32>
      %c0_37 = arith.constant 0 : index
      %c0_38 = arith.constant 0 : index
      %44 = vector.load %arg8[%c0_37, %c0_38] : memref<2x8xf32, #tpu.memory_space<vmem>>, vector<2x8xf32>
      tpu.vector_store %arg8[%c0_37, %c0_38], %43 {strides = array<i32>} : memref<2x8xf32, #tpu.memory_space<vmem>>, vector<2x8xf32>,
    } else {
    }
    return
  }
  func.func @transform_0(%arg0: i32, %arg1: i32) -> (i32, i32, i32) {
    %c0_i32 = arith.constant 0 : i32
    %c0_i32_0 = arith.constant 0 : i32
    return %arg0, %c0_i32, %arg1 : i32, i32, i32
  }
  func.func @transform_1(%arg0: i32, %arg1: i32) -> (i32, i32, i32) {
    %c0_i32 = arith.constant 0 : i32
    %c0_i32_0 = arith.constant 0 : i32
    %c0_i32_1 = arith.constant 0 : i32
    %c0_i32_2 = arith.constant 0 : i32
    return %c0_i32, %c0_i32_0, %c0_i32_1 : i32, i32, i32
  }
  func.func @transform_2(%arg0: i32, %arg1: i32) -> (i32, i32) {
    %c0_i32 = arith.constant 0 : i32
    %c0_i32_0 = arith.constant 0 : i32
    %c0_i32_1 = arith.constant 0 : i32
    return %c0_i32, %c0_i32_0 : i32, i32
  }
  func.func @transform_3(%arg0: i32, %arg1: i32) -> (i32, i32) {
    %c0_i32 = arith.constant 0 : i32
    %c0_i32_0 = arith.constant 0 : i32
    %c0_i32_1 = arith.constant 0 : i32
    return %c0_i32, %c0_i32_0 : i32, i32
  }
  func.func @transform_4(%arg0: i32, %arg1: i32) -> (i32, i32) {
    %c0_i32 = arith.constant 0 : i32
    %c0_i32_0 = arith.constant 0 : i32
    %c0_i32_1 = arith.constant 0 : i32
    return %c0_i32, %c0_i32_0 : i32, i32
  }
  func.func @transform_5(%arg0: i32, %arg1: i32) -> (i32, i32) {
    %c0_i32 = arith.constant 0 : i32
    %c0_i32_0 = arith.constant 0 : i32
    return %arg0, %c0_i32 : i32, i32
  }
  func.func @transform_6(%arg0: i32, %arg1: i32) -> (i32, i32) {
    %c0_i32 = arith.constant 0 : i32
    %c0_i32_0 = arith.constant 0 : i32
    return %arg0, %c0_i32 : i32, i32
  }
}

</mosaic_0001>

<bundles_post_ra>
// kernel: tpu_custom_call.1
= control target key start
LH: loop header
LB: loop body
LE: loop exit
PB: predicated region body
PF: predicated region fallthrough
CT: control target
= control target key end

     0   :  { %s1736_s0 = inlined_call_operand.hbm [shape: f32[2,32,512], index: 0, kind: input, shape index: {}]   ;;  %s1737_s1 = inlined_call_operand.hbm [shape: f32[3,32,64], index: 1, kind: input, shape index: {}]   ;;  %s1738_s2 = inlined_call_operand.vmem [shape: f32[1,64], index: 2, kind: input, shape index: {}]   ;;  %s1739_s3 = inlined_call_operand.vmem [shape: f32[64,8], index: 3, kind: input, shape index: {}]   ;;  %s1740_s4 = inlined_call_operand.vmem [shape: f32[1,8], index: 4, kind: input, shape index: {}]   ;;  %s1741_s5 = inlined_call_operand.hbm [shape: f32[2,64], index: 5, kind: output, shape index: {0}]   ;;  %s1742_s6 = inlined_call_operand.hbm [shape: f32[2,8], index: 6, kind: output, shape index: {1}]  }
   0x1   :  { %1747 = sst [smem:[#allocation16_spill]] %s1742_s6 }
   0x2   :  { %12 = vsyncpa [#allocation5], 0 }
   0x3   :  { %14 = vsyncpa [#allocation5 + $0x1], 0 }
   0x4   :  { %15 = vsyncpa [#allocation8], 0 }
   0x5   :  { %16 = vsyncpa [#allocation6], 0 }
   0x6   :  { %17 = vsyncpa [#allocation11], 0  ;;  %s1424_s21 = smov 0   ;;  %s1426_s22 = smov 0  }
   0x7   :  { %s1428_s23 = smov 0   ;;  %s1430_s24 = smov 0  }
   0x8   :  { %s1432_s25 = smov 0   ;;  %s1434_s26 = smov 0  }
   0x9 LB: > { %s1744_s27 = sadd.s32 4294967295, %s1375_s26   ;;  %p51_p0 = scmp.ne.s32.totalorder %s1363_s23, %s1359_s22  ;;  %s1375_s26 = sphi %s1434_s26, %s23_s26   ;;  %s1371_s25 = sphi %s1432_s25, %s1763_s25   ;;  %s1367_s24 = sphi %s1430_s24, %s1762_s24   ;;  %s1363_s23 = sphi %s1428_s23, %s1761_s23   ;;  %s1359_s22 = sphi %s1426_s22, %s1760_s22   ;;  %s1355_s21 = sphi %s1424_s21, %s1759_s21  }
   0xa   : > { %p52_p1 = scmp.eq.s32.totalorder %s1375_s26, 0  ;;  %p57_p2 = scmp.ne.s32.totalorder %s1359_s22, %s1355_s21 }
   0xb   : > { %p1459_p3 = scmp.eq.s32.totalorder %s1744_s27, 0  ;;  %p1021_p4 = scmp.ge.s32.totalorder %s1375_s26, 1 }
   0xc   : > { %p53_p5 = por %p52_p1, %p51_p0  ;;  %p204_p6 = scmp.lt.s32.totalorder %s1375_s26, 5 }
   0xd   : > { %p1467_p7 = por %p1459_p3, %p57_p2  ;;  %s1377_s7 = smov [#allocation7]  }
   0xe   : > { %p1471_p8 = pnand %p1021_p4, %p204_p6  ;;  %s216_s8 = sshll.u32 %s1377_s7, 4  ;;  %s217_s8 = int_to_ptr.vmem [resolvable:$true] %s216_s8 }
   0xf   : > { %s1749_s29 = scalar_select %p1467_p7, 1, 0 }
  0x10   : > { %p1133_p9 = pneg %p1471_p8  ;;  %p1142_p11 = scmp.lt.s32.totalorder %s1375_s26, 4 }
  0x11   : > { %s44_s10 = sadd.s32 1, %s1363_s23  ;;  %s1222_s12 = scalar_lea.vmem %s217_s8, 1536 }
  0x12   : > { %p1479_p10 = pnand %p1133_p9, %p1459_p3  ;;  %p1485_p12 = pnand %p1142_p11, %p53_p5 }
  0x13   : > { %p1223_p0 = scmp.ne.s32.totalorder %s217_s8, %s1222_s12  ;;  %p1230_p4 = scmp.lt.s32.totalorder %s217_s8, %s217_s8 }
  0x14   : > { %p1213_p13 = pneg %p1479_p10  ;;  %p1231_p6 = scmp.lt.s32.totalorder %s1222_s12, %s1222_s12 }
  0x16   : > { %p1225_p1 = pnand %p1223_p0, %p1213_p13  ;;  %p1232_p7 = por %p1231_p6, %p1230_p4 }
  0x18   : > { %p1226_p2 = pneg %p1225_p1 }
  0x1a   : > { %p1233_p9 = pnand %p1232_p7, %p1226_p2 }
  0x1c   : > { %1236 = shalt.err (!%p1233_p9)
}
  0x1d   : > { %s1745_s13 = smov 128   ;;  %s1746_s14 = smov 8  }
  0x1e   : > { %1136 = dma.hbm_to_vmem [thread:$0]  (!%p1479_p10), %s1737_s1, 1536, %s217_s8, [#allocation8], %s1745_s13, %s1745_s13, %s1746_s14  }
  0x1f   : > { %s32_s17 = sadd.s32 1, %s1371_s25  ;;  %s239_s18 = sand.u32 1, %s1363_s23  }
  0x20   : > { %p33_p5 = scmp.ge.s32.totalorder %s32_s17, 4  ;;  %s1024_s19 = sshll.u32 %s239_s18, 6 }
  0x21   : > { %s1025_s20 = sshll.u32 %s1371_s25, 7  ;;  %s243_s27 = scalar_lea.vmem [#allocation4], %s1024_s19 }
  0x22   : > { %s1765_s17 = smov (%p33_p5, %s32_s17), 0  ;;  %s251_s9 = scalar_lea.hbm %s1736_s0, %s1025_s20 }
  0x23   : > { %s40_s12 = ssub.s32 %s1371_s25, %s1765_s17  ;;  %s252_s6 = sshll.u32 %s243_s27, 4  ;;  %s253_s6 = int_to_ptr.vmem [resolvable:$true] %s252_s6 }
  0x24   : > { %p42_p7 = scmp.eq.s32.totalorder %s40_s12, 0  ;;  %s240_s8 = scalar_lea.sflag [#allocation5], %s239_s18 }
  0x25   : > { %p1239_p10 = pneg %p1485_p12  ;;  %s1250_s16 = scalar_lea.vmem %s253_s6, 1024 }
  0x26   : > { %s1510_s15 = scalar_select %p42_p7, %s1363_s23, %s44_s10  }
  0x27   : > { %p1251_p11 = scmp.ne.s32.totalorder %s253_s6, %s1250_s16  ;;  %s1380_s13 = smov [#allocation4]  }
  0x28   : > { %s1255_s14 = sshll.u32 %s1380_s13, 4  ;;  %s1256_s14 = int_to_ptr.vmem [resolvable:$false] %s1255_s14 }
  0x29   : > { %p1253_p13 = pnand %p1251_p11, %p1239_p10  ;;  %s1257_s21 = scalar_lea.vmem %s1256_s14, 2048 }
  0x2a   : > { %p1258_p1 = scmp.lt.s32.totalorder %s253_s6, %s1256_s14  ;;  %p1259_p2 = scmp.lt.s32.totalorder %s1257_s21, %s1250_s16 }
  0x2b   : > { %p1254_p0 = pneg %p1253_p13 }
  0x2c   : > { %p1260_p4 = por %p1259_p2, %p1258_p1 }
  0x2e   : > { %p1261_p6 = pnand %p1260_p4, %p1254_p0 }
  0x30   : > { %1264 = shalt.err (!%p1261_p6)
}
  0x31   : > { %s1381_s27 = smov 512   ;;  %s1753_s10 = smov 8  }
  0x32   : > { %s1754_s18 = smov 128   ;;  %264 = sbr.rel (%p1471_p8) target bundleno = 820 (0x334), region = 40 }
  0x33   : > { %1140 = dma.hbm_to_vmem [thread:$0]  (!%p1485_p12), %s251_s9, 1024, %s253_s6, %s240_s8, %s1381_s27, %s1754_s18, %s1753_s10  }
  0x34   : > { %s266_s19 = sand.u32 (!%p1471_p8), 1, %s1359_s22   ;;  %p1755_p9 = scmp.ne.s32.totalorder (!%p1471_p8), %s1749_s29, 0 }
  0x35   : > { %s1027_s13 = sshll.u32 (!%p1471_p8), %s266_s19, 6  ;;  %s267_s20 = scalar_lea.sflag (!%p1471_p8), [#allocation5], %s266_s19 }
  0x36   : > { %s270_s7 = scalar_lea.vmem (!%p1471_p8), [#allocation4], %s1027_s13 }
  0x37   : > { %1338 = dma.done.wait (%p1755_p9), %s267_s20, 1024  }
  0x38   : > { %1340 = vsyncadd (%p1755_p9), %s267_s20, 4294966272 }
  0x39   : > { %1342 = dma.done.wait (%p1459_p3), [#allocation8], 1536  }
  0x3a   : > { %1344 = vsyncadd (%p1459_p3), [#allocation8], 4294965760  ;;  %v1529_v0 = vld [vmem:[%s270_s7] sm:$0xff]  ;;  %v1531_v1 = vld [vmem:[%s270_s7 + $0x8] sm:$0xff]  ;;  %p1029_p8 = scmp.ne.s32.totalorder %s1367_s24, 0 }
  0x3b   : > { %v1533_v2 = vld [vmem:[%s270_s7 + $0x10] sm:$0xff]  ;;  %v1535_v3 = vld [vmem:[%s270_s7 + $0x18] sm:$0xff]  ;;  %v1537_v4 = vld [vmem:[%s270_s7 + $0x20] sm:$0xff] }
  0x3c   : > { %v1539_v5 = vld [vmem:[%s270_s7 + $0x28] sm:$0xff]  ;;  %v1541_v6 = vld [vmem:[%s270_s7 + $0x30] sm:$0xff]  ;;  %v1543_v7 = vld [vmem:[%s270_s7 + $0x38] sm:$0xff]  ;;  %310 = sbr.rel (%p1029_p8) target bundleno = 71 (0x47), region = 52 }
  0x41   : > { %vm311_vm0 = vcmask 254976   ;;  %vm313_vm1 = vcmask 7168   ;;  %v1382_v8 = vmov 0.0  }
  0x42   : > { %312 = vst.msk [vmem:[#allocation2] sm:$0x3] %vm311_vm0, %v1382_v8 }
  0x43   : > { %314 = vst.msk [vmem:[#allocation3] sm:$0xff] %vm313_vm1, %v1529_v0  ;;  %315 = vst.msk [vmem:[#allocation3 + $0x8] sm:$0xff] %vm313_vm1, %v1531_v1 }
  0x44   : > { %316 = vst.msk [vmem:[#allocation3 + $0x10] sm:$0xff] %vm313_vm1, %v1533_v2  ;;  %317 = vst.msk [vmem:[#allocation3 + $0x18] sm:$0xff] %vm313_vm1, %v1535_v3 }
  0x45   : > { %318 = vst.msk [vmem:[#allocation3 + $0x20] sm:$0xff] %vm313_vm1, %v1537_v4  ;;  %319 = vst.msk [vmem:[#allocation3 + $0x28] sm:$0xff] %vm313_vm1, %v1539_v5 }
  0x46   : > { %320 = vst.msk [vmem:[#allocation3 + $0x30] sm:$0xff] %vm313_vm1, %v1541_v6  ;;  %321 = vst.msk [vmem:[#allocation3 + $0x38] sm:$0xff] %vm313_vm1, %v1543_v7 }
  0x47 PF: > { %331 = vadd.xlane.f32.xlu1 %v1537_v4  ;;  %323 = vadd.xlane.f32.xlu0 %v1529_v0  ;;  %v347_v9 = vlaneseq  ;;  %vm358_vm2 = vcmask 130112   ;;  %vm365_vm3 = vcmask 195712   ;;  %vm372_vm4 = vcmask 261312   ;;  %p1030_p3 = scmp.ne.s32.totalorder %s1367_s24, 3 }
  0x48   : > { %vm393_vm5 = vcmask 1041409   ;;  %vm397_vm6 = vcmask 254976  }
  0x49   : > { %v348_v10 = vand.u32 127, %v347_v9  ;;  %v350_v15 = vshrl.u32 %v347_v9, 7  ;;  %v322_v39 = vld [vmem:[#allocation2] sm:$0x3] }
  0x4b   : > { %333 = vadd.xlane.f32.xlu1 %v1539_v5  ;;  %325 = vadd.xlane.f32.xlu0 %v1531_v1  ;;  %v353_v13 = vadd.s32 4294967288, %v348_v10  ;;  %v360_v14 = vadd.s32 4294967280, %v348_v10  ;;  %v367_v19 = vadd.s32 4294967272, %v348_v10  ;;  %v1566_v21 = vsub.s32 %v348_v10, %v350_v15 }
  0x4d   : > { %v1562_v18 = vsub.s32 %v353_v13, %v350_v15  ;;  %v1564_v20 = vsub.s32 %v360_v14, %v350_v15  ;;  %v1570_v26 = vsub.s32 %v367_v19, %v350_v15 }
  0x4f   : > { %335 = vadd.xlane.f32.xlu1 %v1541_v6  ;;  %327 = vadd.xlane.f32.xlu0 %v1533_v2 }
  0x53   : > { %337 = vadd.xlane.f32.xlu1 %v1543_v7  ;;  %329 = vadd.xlane.f32.xlu0 %v1535_v3 }
  0xd0   : > { %v332_v11 = vpop.xlane.xlu1 %331  ;;  %v324_v12 = vpop.xlane.xlu0 %323 }
  0xd1   : > { %v377_v29 = vrot.slane %v332_v11, %v1566_v21  ;;  %v352_v30 = vrot.slane %v324_v12, %v1566_v21 }
  0xd4   : > { %v334_v16 = vpop.xlane.xlu1 %333  ;;  %v326_v17 = vpop.xlane.xlu0 %325 }
  0xd5   : > { %v381_v24 = vrot.slane %v334_v16, %v1562_v18  ;;  %v357_v25 = vrot.slane %v326_v17, %v1562_v18 }
  0xd7   : > { %v382_v33 = vsel %vm358_vm2, %v381_v24, %v377_v29  ;;  %v359_v34 = vsel %vm358_vm2, %v357_v25, %v352_v30 }
  0xd8   : > { %v336_v22 = vpop.xlane.xlu1 %335  ;;  %v328_v23 = vpop.xlane.xlu0 %327 }
  0xd9   : > { %v386_v27 = vrot.slane %v336_v22, %v1564_v20  ;;  %v364_v28 = vrot.slane %v328_v23, %v1564_v20 }
  0xdb   : > { %v387_v37 = vsel %vm365_vm3, %v386_v27, %v382_v33  ;;  %v366_v38 = vsel %vm365_vm3, %v364_v28, %v359_v34 }
  0xdc   : > { %v338_v31 = vpop.xlane.xlu1 %337  ;;  %v330_v32 = vpop.xlane.xlu0 %329 }
  0xdd   : > { %v391_v35 = vrot.slane %v338_v31, %v1570_v26  ;;  %v371_v36 = vrot.slane %v330_v32, %v1570_v26 }
  0xdf   : > { %v392_v40 = vsel %vm372_vm4, %v391_v35, %v387_v37  ;;  %v373_v41 = vsel %vm372_vm4, %v371_v36, %v366_v38  ;;  %402 = sbr.rel (%p1030_p3) target bundleno = 786 (0x312), region = 56 }
  0xe0   : > { %v394_v42 = vsel %vm393_vm5, %v392_v40, %v373_v41 }
  0xe1   : > { %v396_v43 = vadd.f32 %v394_v42, %v322_v39 }
  0xe3   : > { %398 = vst.msk [vmem:[#allocation2] sm:$0x3] %vm397_vm6, %v396_v43 }
  0xe4   : > { %v1383_v44 = vmov 127   ;;  %v1384_v45 = vmov 0.0   ;;  %v501_v46 = vld [vmem:[#allocation7 + $0x38] sm:$0xff]  ;;  %v500_v48 = vld [vmem:[#allocation7 + $0x30] sm:$0xff]  ;;  %v499_v50 = vld [vmem:[#allocation7 + $0x28] sm:$0xff]  ;;  %vm1385_vm7 = vmmov 0  }
  0xe5   : > { %1208 = vset.pattern.permute.xlu1 %v1383_v44  ;;  %1207 = vset.pattern.permute.xlu0 %v1383_v44  ;;  %v496_v47 = vld [vmem:[#allocation7 + $0x18] sm:$0xff]  ;;  %v495_v49 = vld [vmem:[#allocation7 + $0x10] sm:$0xff]  ;;  %v494_v51 = vld [vmem:[#allocation7 + $0x8] sm:$0xff]  ;;  %v1386_v56 = vmov 0   ;;  %vm502_vm8 = vcmask 261120   ;;  %vm818_vm9 = vcmask 517120  }
  0xe6   : > { %441 = vperm.xlu1 %1208, %v1537_v4   ;;  %429 = vperm.xlu0 %1207, %v1529_v0   ;;  %v498_v52 = vld [vmem:[#allocation7 + $0x20] sm:$0xff]  ;;  %v405_v53 = vld [vmem:[#allocation3 + $0x8] sm:$0xff]  ;;  %v406_v60 = vld [vmem:[#allocation3 + $0x10] sm:$0xff]  ;;  %vm836_vm10 = vcmask 523264   ;;  %vm910_vm11 = vcmask 58368  }
  0xe7   : > { %1067 = vmatprep.subr.mxu0 %v1384_v45  ;;  %1078 = vmatprep.subr.mxu1 %v1384_v45  ;;  %v404_v54 = vld [vmem:[#allocation3] sm:$0xff]  ;;  %v409_v58 = vld [vmem:[#allocation3 + $0x28] sm:$0xff]  ;;  %v410_v61 = vld [vmem:[#allocation3 + $0x30] sm:$0xff] }
  0xe8   : > { %1068 = vmatpush3.msra.mxu0 %v501_v46  ;;  %1079 = vmatpush3.msra.mxu1 %v496_v47  ;;  %v493_v55 = vld [vmem:[#allocation7] sm:$0xff]  ;;  %v734_v62 = vld [vmem:[#allocation7 + $0x58] sm:$0xff]  ;;  %v733_v63 = vld [vmem:[#allocation7 + $0x50] sm:$0xff] }
  0xe9   : > { %1069 = vmatprep.subr.mxu0 %v1384_v45  ;;  %1080 = vmatprep.subr.mxu1 %v1384_v45  ;;  %v408_v57 = vld [vmem:[#allocation3 + $0x20] sm:$0xff]  ;;  %v407_v0 = vld [vmem:[#allocation3 + $0x18] sm:$0xff] }
  0xea   : > { %444 = vperm.xlu1 %1208, %v1539_v5   ;;  %432 = vperm.xlu0 %1207, %v1531_v1   ;;  %v1606_v59 = vld [vmem:[#allocation2] sm:$0x3] }
  0xeb   : > { %1070 = vmatpush3.msra.mxu0 %v500_v48  ;;  %1081 = vmatpush3.msra.mxu1 %v495_v49  ;;  %v411_v1 = vld [vmem:[#allocation3 + $0x38] sm:$0xff] }
  0xec   : > { %1071 = vmatprep.subr.mxu0 %v1384_v45  ;;  %1082 = vmatprep.subr.mxu1 %v1384_v45 }
  0xed   : > { %1072 = vmatpush3.msra.mxu0 %v499_v50  ;;  %1083 = vmatpush3.msra.mxu1 %v494_v51 }
  0xee   : > { %447 = vperm.xlu1 %1208, %v1541_v6   ;;  %435 = vperm.xlu0 %1207, %v1533_v2   ;;  %v732_v2 = vld [vmem:[#allocation7 + $0x48] sm:$0xff] }
  0xef   : > { %1073 = vmatprep.subr.mxu0 %v1384_v45  ;;  %1084 = vmatprep.subr.mxu1 %v1384_v45 }
  0xf0   : > { %1074 = vmatpush3.msra.mxu0 %v498_v52  ;;  %1075 = vmatprep.mubr.msk.f32.mxu0 %vm1385_vm7, %v1384_v45 }
  0xf1   : > { %1085 = vmatpush3.msra.mxu1 %v493_v55  ;;  %1086 = vmatprep.mubr.msk.f32.mxu1 %vm1385_vm7, %v1384_v45  ;;  %v826_v55 = vld [vmem:[%s1739_s3 + $0x28] sm:$0xff] }
  0xf2   : > { %450 = vperm.xlu1 %1208, %v1543_v7   ;;  %438 = vperm.xlu0 %1207, %v1535_v3   ;;  %v731_v3 = vld [vmem:[#allocation7 + $0x40] sm:$0xff] }
  0xf3   : > { %1076 = vmatmul.mubr.msk.f32.vlgmr.msra.gmra.mxu0 %vm502_vm8, %v1606_v59  ;;  %1089 = vmatprep.subr.mxu0 %v1384_v45 }
  0xf4   : > { %1097 = vmatprep.mubr.msk.f32.mxu0 %vm1385_vm7, %v1384_v45  ;;  %1100 = vmatprep.subr.mxu1 %v1384_v45 }
  0xf5   : > { %1090 = vmatpush3.msra.mxu0 %v734_v62  ;;  %v821_v62 = vld [vmem:[%s1739_s3] sm:$0xff] }
  0xf6   : > { %1210 = vset.pattern.permute.xlu1 %v1386_v56  ;;  %1209 = vset.pattern.permute.xlu0 %v1386_v56 }
  0xf7   : > { %669 = vperm.xlu1 %1210, %v405_v53   ;;  %666 = vperm.xlu0 %1209, %v404_v54   ;;  %v828_v54 = vld [vmem:[%s1739_s3 + $0x38] sm:$0xff] }
  0xf8   : > { %1091 = vmatprep.subr.mxu0 %v1384_v45 }
  0xf9   : > { %1092 = vmatpush3.msra.mxu0 %v733_v63 }
  0xfa   : > { %1093 = vmatprep.subr.mxu0 %v1384_v45 }
  0xfb   : > { %678 = vperm.xlu1 %1210, %v408_v57   ;;  %681 = vperm.xlu0 %1209, %v409_v58   ;;  %v825_v58 = vld [vmem:[%s1739_s3 + $0x20] sm:$0xff] }
  0xfc   : > { %1094 = vmatpush3.msra.mxu0 %v732_v2 }
  0xfd   : > { %1095 = vmatprep.subr.mxu0 %v1384_v45 }
  0xfe   : > { %1096 = vmatpush3.msra.mxu0 %v731_v3 }
  0xff   : > { %672 = vperm.xlu1 %1210, %v406_v60   ;;  %684 = vperm.xlu0 %1209, %v410_v61   ;;  %v823_v60 = vld [vmem:[%s1739_s3 + $0x10] sm:$0xff]  ;;  %v822_v61 = vld [vmem:[%s1739_s3 + $0x8] sm:$0xff] }
 0x103   : > { %675 = vperm.xlu1 %1210, %v407_v0   ;;  %687 = vperm.xlu0 %1209, %v411_v1  }
 0x161   : > { %v442_v4 = vpop.permute.xlu1 %441  ;;  %v430_v5 = vpop.permute.xlu0 %429 }
 0x162   : > { %v474_v14 = vrot.slane %v442_v4, %v1566_v21  ;;  %v455_v15 = vrot.slane %v430_v5, %v1566_v21  ;;  %v1034_v4 = vld [vmem:[%s1738_s2] ss:$0 sm:$0xff] }
 0x165   : > { %v445_v6 = vpop.permute.xlu1 %444  ;;  %v433_v7 = vpop.permute.xlu0 %432 }
 0x166   : > { %v478_v10 = vrot.slane %v445_v6, %v1562_v18  ;;  %v459_v11 = vrot.slane %v433_v7, %v1562_v18 }
 0x168   : > { %v479_v19 = vsel %vm358_vm2, %v478_v10, %v474_v14  ;;  %v460_v22 = vsel %vm358_vm2, %v459_v11, %v455_v15 }
 0x169   : > { %v448_v8 = vpop.permute.xlu1 %447  ;;  %v436_v9 = vpop.permute.xlu0 %435 }
 0x16a   : > { %v483_v12 = vrot.slane %v448_v8, %v1564_v20  ;;  %v464_v13 = vrot.slane %v436_v9, %v1564_v20  ;;  %v1035_v8 = vld [vmem:[%s1740_s4] ss:$0 sm:$0xff] }
 0x16c   : > { %v484_v25 = vsel %vm365_vm3, %v483_v12, %v479_v19  ;;  %v465_v27 = vsel %vm365_vm3, %v464_v13, %v460_v22 }
 0x16d   : > { %v451_v16 = vpop.permute.xlu1 %450  ;;  %v439_v17 = vpop.permute.xlu0 %438 }
 0x16e   : > { %v488_v23 = vrot.slane %v451_v16, %v1570_v26  ;;  %v469_v24 = vrot.slane %v439_v17, %v1570_v26 }
 0x170   : > { %v489_v28 = vsel %vm372_vm4, %v488_v23, %v484_v25  ;;  %v470_v29 = vsel %vm372_vm4, %v469_v24, %v465_v27 }
 0x171   : > { %v490_v30 = vsel %vm393_vm5, %v489_v28, %v470_v29 }
 0x172   : > { %v670_v31 = vpop.permute.xlu1 %669  ;;  %v667_v32 = vpop.permute.xlu0 %666  ;;  %v492_v33 = vsub.f32 %v1606_v59, %v490_v30 }
 0x173   : > { %v696_v38 = vrot.slane %v670_v31, %v1562_v18  ;;  %v692_v39 = vrot.slane %v667_v32, %v1566_v21 }
 0x174   : > { %1087 = vmatmul.mubr.msk.f32.vlgmr.msra.gmra.mxu1 %vm502_vm8, %v492_v33 }
 0x175   : > { %1116 = vmatprep.mubr.msk.f32.mxu1 %vm1385_vm7, %v1384_v45  ;;  %v697_v47 = vsel %vm358_vm2, %v696_v38, %v692_v39  ;;  %1101 = vmatpush3.msra.mxu1 %v828_v54 }
 0x176   : > { %v679_v34 = vpop.permute.xlu1 %678  ;;  %v682_v35 = vpop.permute.xlu0 %681  ;;  %1102 = vmatprep.subr.mxu1 %v1384_v45 }
 0x177   : > { %v711_v40 = vrot.slane %v679_v34, %v1566_v21  ;;  %v715_v41 = vrot.slane %v682_v35, %v1562_v18 }
 0x179   : > { %v716_v48 = vsel %vm358_vm2, %v715_v41, %v711_v40 }
 0x17a   : > { %v673_v36 = vpop.permute.xlu1 %672  ;;  %v685_v37 = vpop.permute.xlu0 %684 }
 0x17b   : > { %v701_v42 = vrot.slane %v673_v36, %v1564_v20  ;;  %v720_v43 = vrot.slane %v685_v37, %v1564_v20 }
 0x17d   : > { %v702_v51 = vsel %vm365_vm3, %v701_v42, %v697_v47  ;;  %v721_v21 = vsel %vm365_vm3, %v720_v43, %v716_v48 }
 0x17e   : > { %v676_v44 = vpop.permute.xlu1 %675  ;;  %v688_v46 = vpop.permute.xlu0 %687 }
 0x17f   : > { %v706_v49 = vrot.slane %v676_v44, %v1570_v26  ;;  %v725_v50 = vrot.slane %v688_v46, %v1570_v26  ;;  %v827_v26 = vld [vmem:[%s1739_s3 + $0x30] sm:$0xff] }
 0x180   : > { %1103 = vmatpush3.msra.mxu1 %v827_v26 }
 0x181   : > { %v707_v18 = vsel %vm372_vm4, %v706_v49, %v702_v51  ;;  %v726_v52 = vsel %vm372_vm4, %v725_v50, %v721_v21  ;;  %1104 = vmatprep.subr.mxu1 %v1384_v45 }
 0x182   : > { %v727_v20 = vsel %vm393_vm5, %v726_v52, %v707_v18  ;;  %1105 = vmatpush3.msra.mxu1 %v826_v55 }
 0x183   : > { %v729_v53 = vsub.f32 %v1606_v59, %v727_v20  ;;  %1106 = vmatprep.subr.mxu1 %v1384_v45  ;;  %v824_v59 = vld [vmem:[%s1739_s3 + $0x18] sm:$0xff] }
 0x184   : > { %1107 = vmatpush3.msra.mxu1 %v825_v58 }
 0x185   : > { %1098 = vmatmul.mubr.msk.f32.vlgmr.msra.gmra.mxu0 %vm502_vm8, %v729_v53  ;;  %1108 = vmatprep.subr.mxu1 %v1384_v45 }
 0x186   : > { %1109 = vmatpush3.msra.mxu1 %v824_v59 }
 0x187   : > { %1110 = vmatprep.subr.mxu1 %v1384_v45 }
 0x188   : > { %1111 = vmatpush3.msra.mxu1 %v823_v60 }
 0x189   : > { %1112 = vmatprep.subr.mxu1 %v1384_v45 }
 0x18a   : > { %1113 = vmatpush3.msra.mxu1 %v822_v61 }
 0x18b   : > { %1114 = vmatprep.subr.mxu1 %v1384_v45 }
 0x18c   : > { %1115 = vmatpush3.msra.mxu1 %v821_v62 }
 0x1b3   : > { %v572_v56 = vpop.f32.mrf.mxu0 }
 0x1b5   : > { %v1077_v57 = vpop.f32.mrf.mxu0 }
 0x234   : > { %v645_v63 = vpop.f32.mrf.mxu1 }
 0x235   : > { %v646_v1 = vadd.f32 %v645_v63, %v572_v56 }
 0x236   : > { %v1088_v0 = vpop.f32.mrf.mxu1 }
 0x245   : > { %v804_v2 = vpop.f32.mrf.mxu0 }
 0x246   : > { %v808_v3 = vadd.f32 %v804_v2, %v646_v1 }
 0x247   : > { %v1099_v5 = vpop.f32.mrf.mxu0 }
 0x248   : > { %v809_v6 = vmul.f32 0.001953125, %v808_v3 }
 0x24a   : > { %v817_v7 = vadd.f32 %v1034_v4, %v809_v6 }
 0x24c   : > { %819 = vst.msk [vmem:[#allocation9] sm:$0x3] %vm818_vm9, %v817_v7  ;;  %v820_v45 = vmax.f32 %v817_v7, 0.0 }
 0x24e   : > { %1117 = vmatmul.mubr.msk.f32.vlgmr.msra.gmra.mxu1 %vm836_vm10, %v820_v45 }
 0x30e   : > { %v906_v9 = vpop.f32.mrf.mxu1 }
 0x30f   : > { %v907_v10 = vadd.f32 %v1035_v8, %v906_v9 }
 0x310   : > { %v1118_v11 = vpop.f32.mrf.mxu1 }
 0x311   : > { %911 = vst.msk [vmem:[#allocation10] sm:$0x3] %vm910_vm11, %v907_v10 }
 0x312 PF: > { %s1756_s24 = sadd.s32 4294967295, %s1375_s26   ;;  %s1387_s29 = smov [#allocation9]  }
 0x313   : > { %p1692_p12 = scmp.eq.s32.totalorder %s1756_s24, 3  ;;  %s921_s30 = sshll.u32 %s1387_s29, 4  ;;  %s922_s30 = int_to_ptr.vmem [resolvable:$true] %s921_s30 }
 0x314   : > { %s1388_s11 = smov [#allocation10]   ;;  %s1265_s9 = scalar_lea.vmem %s922_s30, 32 }
 0x315   : > { %s934_s14 = sshll.u32 %s1388_s11, 4  ;;  %p1266_p5 = scmp.ne.s32.totalorder %s922_s30, %s1265_s9  ;;  %s935_s14 = int_to_ptr.vmem [resolvable:$true] %s934_s14 }
 0x316   : > { %p1272_p11 = scmp.lt.s32.totalorder %s922_s30, %s922_s30  ;;  %p1273_p13 = scmp.lt.s32.totalorder %s1265_s9, %s1265_s9 }
 0x317   : > { %p1267_p7 = pnand %p1266_p5, %p1692_p12 }
 0x318   : > { %p1274_p0 = por %p1273_p13, %p1272_p11 }
 0x319   : > { %p1268_p10 = pneg %p1267_p7 }
 0x31b   : > { %p1275_p1 = pnand %p1274_p0, %p1268_p10 }
 0x31d   : > { %1278 = shalt.err (!%p1275_p1)
}
 0x31e   : > { %1126 = dma.vmem_to_hbm [thread:$0]  (%p1692_p12), %s922_s30, 32, %s1741_s5, [#allocation6]  }
 0x31f   : > { %s1289_s16 = scalar_lea.vmem %s935_s14, 32  ;;  %p1296_p9 = scmp.lt.s32.totalorder %s935_s14, %s935_s14 }
 0x320   : > { %p1290_p2 = scmp.ne.s32.totalorder %s935_s14, %s1289_s16  ;;  %p1297_p8 = scmp.lt.s32.totalorder %s1289_s16, %s1289_s16 }
 0x322   : > { %p1291_p4 = pnand %p1290_p2, %p1692_p12  ;;  %p1298_p3 = por %p1297_p8, %p1296_p9 }
 0x324   : > { %p1292_p6 = pneg %p1291_p4 }
 0x326   : > { %p1299_p5 = pnand %p1298_p3, %p1292_p6 }
 0x328   : > { %1302 = shalt.err (!%p1299_p5)
}
 0x329   : > { %s1758_s10 = sld [smem:[#allocation16_spill]] }
 0x32f   : > { %1128 = dma.vmem_to_hbm [thread:$0]  (%p1692_p12), %s935_s14, 32, %s1758_s10, [#allocation11]  }
 0x330   : > { %1346 = dma.done.wait (%p1692_p12), [#allocation6], 32  }
 0x331   : > { %1348 = vsyncadd (%p1692_p12), [#allocation6], 4294967264 }
 0x332   : > { %1350 = dma.done.wait (%p1692_p12), [#allocation11], 32  }
 0x333   : > { %1352 = vsyncadd (%p1692_p12), [#allocation11], 4294967264 }
 0x334 PF: > { %s23_s26 = sadd.s32 1, %s1375_s26   ;;  %s1759_s21 = smov %s1359_s22 }
 0x335   : > { %p20_p7 = scmp.ge.s32.totalorder %s23_s26, 6   ;;  %s1760_s22 = smov %s1363_s23 }
 0x336   : > { %s1761_s23 = smov %s1510_s15  ;;  %s1762_s24 = smov %s1371_s25 }
 0x337   : > { %s1763_s25 = smov %s1765_s17  ;;  %22 = sbr.rel (!%p20_p7) target bundleno = 9 (0x9), region = 101 }
 0x33c   :  { %951 = vsyncpa [#allocation5], 1 }
 0x33d   :  { %953 = vsyncpa [#allocation5 + $0x1], 1 }
 0x33e   :  { %954 = vsyncpa [#allocation8], 1 }
 0x33f   :  { %955 = vsyncpa [#allocation6], 1 }
 0x340   :  { %957 = vsyncpa [#allocation6 + $0x1], 1 }
 0x341   :  { %958 = vsyncpa [#allocation11], 1 }

</bundles_post_ra>
